<compile_context>
chip_gen: v6e
topology: v6e:2x2x1
jax: 0.10.0
libtpu: 0.0.40
codegen_flags: <defaults>
</compile_context>

<pallas_src>
import functools

import jax
import jax.numpy as jnp
from jax import lax
from jax.experimental import pallas as pl
from jax.experimental.pallas import tpu as pltpu


_LANE_TILE_DEFAULT = 4096  # lanes per grid step (multiple of 128); VMEM-safe on v7x


def _mix_i32(x):
    """Cheap int32 avalanche hash (xor / shift / wrapping-mul only)."""
    x = (x ^ (x >> 16)) * jnp.int32(0x45D9F3B)
    x = (x ^ (x >> 16)) * jnp.int32(0x45D9F3B)
    return x ^ (x >> 16)


def _bits_to_unit(bits):
    """Low 24 bits of an int32 hash -> uniform float32 in [0, 1)."""
    return (bits & jnp.int32(0x00FFFFFF)).astype(jnp.float32) * jnp.float32(
        1.0 / (1 << 24)
    )


def _bilinear_jitter_unit(ctr):
    """Unit-scale bilinear blur-kernel jitter (before / sidelength).

    Matches forward_bilinear: Y = sqrt(U1) - 1, Z = 1 - sqrt(U2),
    Q_unit = b ? Y : Z with b ~ Bernoulli(0.5).
    """
    bits1 = _mix_i32(ctr)
    bits2 = _mix_i32(ctr ^ jnp.int32(0x6A09E667))
    y = jnp.sqrt(_bits_to_unit(bits1)) - jnp.float32(1.0)  # in [-1, 0]
    z = jnp.float32(1.0) - jnp.sqrt(_bits_to_unit(bits2))  # in [0, 1]
    b = (bits1 & jnp.int32(1 << 24)) == 0  # reuse an unconsumed hash bit
    return jnp.where(b, y, z)


def _downsample_kernel(coords_ref, seed_ref, inv_side_ref, out_ref, *, row_stride):
    """coords_ref/out_ref: (B, tN) f32 blocks of the flattened (B, 2N) coords.

    seed_ref     : (1,) int32 in SMEM
    inv_side_ref : (2,) f32 in SMEM  (1/H, 1/W)
    """
    blk_b, blk_n = out_ref.shape
    row = lax.broadcasted_iota(jnp.int32, (blk_b, blk_n), 0)
    col = lax.broadcasted_iota(jnp.int32, (blk_b, blk_n), 1)
    gcol = pl.program_id(0) * blk_n + col  # global lane index (unique per tile)

    # Globally unique per-element counter, mixed with the seed.
    ctr = row * row_stride + gcol + seed_ref[0] * jnp.int32(1000003)

    q = _bilinear_jitter_unit(ctr)

    # Even lanes carry u (-> 1/sidelength[0]), odd lanes carry v (-> 1/sidelength[1]).
    inv = jnp.where((col & 1) == 0, inv_side_ref[0], inv_side_ref[1])

    out_ref[...] = coords_ref[...] + q * inv


def image_downsampling_forward(
    coords, sidelength, *, downsample=False, seed=0, lane_tile=_LANE_TILE_DEFAULT
):
    """JAX/Pallas equivalent of ImageDownsampling.forward.

    coords     : (B, N, 2) float32
    sidelength : scalar or (2,) float (H, W)
    """
    if not downsample:
        return coords

    coords = jnp.asarray(coords, jnp.float32)
    B, N, C = coords.shape  # C == 2 (u, v)
    F = N * C

    flat = coords.reshape(B, F)  # metadata-only view, interleaved (u, v)

    side = jnp.asarray(sidelength, jnp.float32)
    if side.ndim == 0:
        side = jnp.full((C,), side, dtype=jnp.float32)
    inv_side = (1.0 / side).reshape(C)
    seed_arr = jnp.asarray([seed], dtype=jnp.int32)

    # Tile the flat lane axis; tn is either the full extent or a multiple of 128.
    tn = F if F <= lane_tile else lane_tile
    num_tiles = pl.cdiv(F, tn)
    row_stride = num_tiles * tn  # padded width -> unique per-element counters

    kernel = functools.partial(_downsample_kernel, row_stride=row_stride)

    out_flat = pl.pallas_call(
        kernel,
        out_shape=jax.ShapeDtypeStruct((B, F), jnp.float32),
        grid=(num_tiles,),
        in_specs=[
            pl.BlockSpec((B, tn), lambda i: (0, i)),
            pl.BlockSpec(memory_space=pltpu.MemorySpace.SMEM),  # seed
            pl.BlockSpec(memory_space=pltpu.MemorySpace.SMEM),  # 1/sidelength
        ],
        out_specs=pl.BlockSpec((B, tn), lambda i: (0, i)),
        compiler_params=pltpu.CompilerParams(
            dimension_semantics=("parallel",),
        ),
    )(flat, seed_arr, inv_side)

    return out_flat.reshape(B, N, C)


def _reference_forward(coords, sidelength, *, seed, row_stride):
    """Pure-JAX reference producing the exact same deterministic jitter."""
    coords = jnp.asarray(coords, jnp.float32)
    B, N, C = coords.shape
    F = N * C
    flat = coords.reshape(B, F)
    side = jnp.asarray(sidelength, jnp.float32).reshape(C)
    inv = 1.0 / side
    row = jnp.arange(B, dtype=jnp.int32)[:, None]
    col = jnp.arange(F, dtype=jnp.int32)[None, :]
    ctr = row * row_stride + col + jnp.int32(seed) * jnp.int32(1000003)
    q = _bilinear_jitter_unit(ctr)
    inv_lane = jnp.where((col & 1) == 0, inv[0], inv[1])
    return (flat + q * inv_lane).reshape(B, N, C)


if __name__ == "__main__":
    key = jax.random.PRNGKey(0)
    B, N = 2, 256
    # coords in [-1, 1], the usual SIREN coordinate-grid convention
    coords = jax.random.uniform(
        key, (B, N, 2), dtype=jnp.float32, minval=-1.0, maxval=1.0
    )
    # __init__: sidelength is a (2,) float tensor, e.g. a 16x16 image
    sidelength = jnp.array([16.0, 16.0], dtype=jnp.float32)

    # --- downsample=True path (single tile) ---
    out = jax.block_until_ready(
        image_downsampling_forward(coords, sidelength, downsample=True, seed=0)
    )
    assert out.shape == coords.shape and out.dtype == jnp.float32

    delta = out - coords
    # jitter Q is bounded by 1/sidelength
    assert float(jnp.max(jnp.abs(delta))) <= (1.0 / 16.0) + 1e-5
    # both the Y (negative) and Z (positive) branches should appear
    assert float(jnp.min(delta)) < 0.0 < float(jnp.max(delta))
    # matches the pure-JAX reference of the same deterministic jitter
    ref = _reference_forward(coords, sidelength, seed=0, row_stride=N * 2)
    assert bool(jnp.allclose(out, ref, atol=1e-5, rtol=1e-5))

    # --- downsample=True path, multi-tile grid with a remainder block ---
    B2, N2 = 2, 320  # F = 640 -> 3 tiles of 256 lanes (last one partial)
    coords2 = jax.random.uniform(
        jax.random.PRNGKey(1), (B2, N2, 2), dtype=jnp.float32, minval=-1.0, maxval=1.0
    )
    out2 = jax.block_until_ready(
        image_downsampling_forward(
            coords2, sidelength, downsample=True, seed=7, lane_tile=256
        )
    )
    row_stride2 = pl.cdiv(N2 * 2, 256) * 256
    ref2 = _reference_forward(coords2, sidelength, seed=7, row_stride=row_stride2)
    assert bool(jnp.allclose(out2, ref2, atol=1e-5, rtol=1e-5))

    # --- downsample=False path (identity) ---
    out_id = jax.block_until_ready(
        image_downsampling_forward(coords, sidelength, downsample=False)
    )
    assert out_id.shape == coords.shape and bool(jnp.all(out_id == coords))

    print("KERNEL_OK")
</pallas_src>

<mosaic_0001>
module attributes {stable_mosaic.version = 11 : i64} {
  func.func @_downsample_kernel(%arg0: i32, %arg1: memref<2x512xf32, #tpu.memory_space<vmem>>, %arg2: memref<1xi32, #tpu.memory_space<smem>>, %arg3: memref<2xf32, #tpu.memory_space<smem>>, %arg4: memref<2x512xf32, #tpu.memory_space<vmem>>) attributes {dimension_semantics = [#tpu.dimension_semantics<parallel>], iteration_bounds = array<i64: 1>, scalar_prefetch = 0 : i64, scratch_operands = 0 : i64, tpu.core_type = #tpu.core_type<tc>, window_params = [{transform_indices = @transform_0, window_bounds = array<i64: 2, 512>}, {transform_indices = @transform_1, window_bounds = array<i64: 1>}, {transform_indices = @transform_2, window_bounds = array<i64: 2>}, {transform_indices = @transform_3, window_bounds = array<i64: 2, 512>}]} {
    %0 = tpu.iota {dimensions = array<i32: 0>} : vector<2x512xi32>
    %1 = tpu.iota {dimensions = array<i32: 1>} : vector<2x512xi32>
    %c512_i32 = arith.constant 512 : i32
    %2 = arith.muli %arg0, %c512_i32 : i32
    %3 = vector.broadcast %2 : i32 to vector<2x512xi32>
    %4 = arith.addi %3, %1 : vector<2x512xi32>
    %c512_i32_0 = arith.constant 512 : i32
    %5 = vector.broadcast %c512_i32_0 : i32 to vector<2x512xi32>
    %6 = arith.muli %0, %5 : vector<2x512xi32>
    %7 = arith.addi %6, %4 : vector<2x512xi32>
    %c0 = arith.constant 0 : index
    %8 = memref.load %arg2[%c0] : memref<1xi32, #tpu.memory_space<smem>>
    %c1000003_i32 = arith.constant 1000003 : i32
    %9 = arith.muli %8, %c1000003_i32 : i32
    %10 = vector.broadcast %9 : i32 to vector<2x512xi32>
    %11 = arith.addi %7, %10 : vector<2x512xi32>
    %c16_i32 = arith.constant 16 : i32
    %12 = vector.broadcast %c16_i32 : i32 to vector<2x512xi32>
    %13 = arith.shrsi %11, %12 : vector<2x512xi32>
    %14 = arith.xori %11, %13 : vector<2x512xi32>
    %c73244475_i32 = arith.constant 73244475 : i32
    %15 = vector.broadcast %c73244475_i32 : i32 to vector<2x512xi32>
    %16 = arith.muli %14, %15 : vector<2x512xi32>
    %c16_i32_1 = arith.constant 16 : i32
    %17 = vector.broadcast %c16_i32_1 : i32 to vector<2x512xi32>
    %18 = arith.shrsi %16, %17 : vector<2x512xi32>
    %19 = arith.xori %16, %18 : vector<2x512xi32>
    %c73244475_i32_2 = arith.constant 73244475 : i32
    %20 = vector.broadcast %c73244475_i32_2 : i32 to vector<2x512xi32>
    %21 = arith.muli %19, %20 : vector<2x512xi32>
    %c16_i32_3 = arith.constant 16 : i32
    %22 = vector.broadcast %c16_i32_3 : i32 to vector<2x512xi32>
    %23 = arith.shrsi %21, %22 : vector<2x512xi32>
    %24 = arith.xori %21, %23 : vector<2x512xi32>
    %c1779033703_i32 = arith.constant 1779033703 : i32
    %25 = vector.broadcast %c1779033703_i32 : i32 to vector<2x512xi32>
    %26 = arith.xori %11, %25 : vector<2x512xi32>
    %c16_i32_4 = arith.constant 16 : i32
    %27 = vector.broadcast %c16_i32_4 : i32 to vector<2x512xi32>
    %28 = arith.shrsi %26, %27 : vector<2x512xi32>
    %29 = arith.xori %26, %28 : vector<2x512xi32>
    %c73244475_i32_5 = arith.constant 73244475 : i32
    %30 = vector.broadcast %c73244475_i32_5 : i32 to vector<2x512xi32>
    %31 = arith.muli %29, %30 : vector<2x512xi32>
    %c16_i32_6 = arith.constant 16 : i32
    %32 = vector.broadcast %c16_i32_6 : i32 to vector<2x512xi32>
    %33 = arith.shrsi %31, %32 : vector<2x512xi32>
    %34 = arith.xori %31, %33 : vector<2x512xi32>
    %c73244475_i32_7 = arith.constant 73244475 : i32
    %35 = vector.broadcast %c73244475_i32_7 : i32 to vector<2x512xi32>
    %36 = arith.muli %34, %35 : vector<2x512xi32>
    %c16_i32_8 = arith.constant 16 : i32
    %37 = vector.broadcast %c16_i32_8 : i32 to vector<2x512xi32>
    %38 = arith.shrsi %36, %37 : vector<2x512xi32>
    %39 = arith.xori %36, %38 : vector<2x512xi32>
    %c16777215_i32 = arith.constant 16777215 : i32
    %40 = vector.broadcast %c16777215_i32 : i32 to vector<2x512xi32>
    %41 = arith.andi %24, %40 : vector<2x512xi32>
    %42 = arith.sitofp %41 : vector<2x512xi32> to vector<2x512xf32>
    %cst = arith.constant 5.96046448E-8 : f32
    %43 = vector.broadcast %cst : f32 to vector<2x512xf32>
    %44 = arith.mulf %42, %43 : vector<2x512xf32>
    %45 = math.sqrt %44 : vector<2x512xf32>
    %cst_9 = arith.constant 1.000000e+00 : f32
    %46 = vector.broadcast %cst_9 : f32 to vector<2x512xf32>
    %47 = arith.subf %45, %46 : vector<2x512xf32>
    %c16777215_i32_10 = arith.constant 16777215 : i32
    %48 = vector.broadcast %c16777215_i32_10 : i32 to vector<2x512xi32>
    %49 = arith.andi %39, %48 : vector<2x512xi32>
    %50 = arith.sitofp %49 : vector<2x512xi32> to vector<2x512xf32>
    %cst_11 = arith.constant 5.96046448E-8 : f32
    %51 = vector.broadcast %cst_11 : f32 to vector<2x512xf32>
    %52 = arith.mulf %50, %51 : vector<2x512xf32>
    %53 = math.sqrt %52 : vector<2x512xf32>
    %cst_12 = arith.constant 1.000000e+00 : f32
    %54 = vector.broadcast %cst_12 : f32 to vector<2x512xf32>
    %55 = arith.subf %54, %53 : vector<2x512xf32>
    %c16777216_i32 = arith.constant 16777216 : i32
    %56 = vector.broadcast %c16777216_i32 : i32 to vector<2x512xi32>
    %57 = arith.andi %24, %56 : vector<2x512xi32>
    %c0_i32 = arith.constant 0 : i32
    %58 = vector.broadcast %c0_i32 : i32 to vector<2x512xi32>
    %59 = arith.cmpi eq, %57, %58 : vector<2x512xi32>
    %60 = arith.select %59, %47, %55 : vector<2x512xi1>, vector<2x512xf32>
    %c1_i32 = arith.constant 1 : i32
    %61 = vector.broadcast %c1_i32 : i32 to vector<2x512xi32>
    %62 = arith.andi %1, %61 : vector<2x512xi32>
    %c0_i32_13 = arith.constant 0 : i32
    %63 = vector.broadcast %c0_i32_13 : i32 to vector<2x512xi32>
    %64 = arith.cmpi eq, %62, %63 : vector<2x512xi32>
    %c0_14 = arith.constant 0 : index
    %65 = memref.load %arg3[%c0_14] : memref<2xf32, #tpu.memory_space<smem>>
    %c1 = arith.constant 1 : index
    %66 = memref.load %arg3[%c1] : memref<2xf32, #tpu.memory_space<smem>>
    %67 = vector.broadcast %65 : f32 to vector<2x512xf32>
    %68 = vector.broadcast %66 : f32 to vector<2x512xf32>
    %69 = arith.select %64, %67, %68 : vector<2x512xi1>, vector<2x512xf32>
    %c0_15 = arith.constant 0 : index
    %c0_16 = arith.constant 0 : index
    %70 = vector.load %arg1[%c0_15, %c0_16] : memref<2x512xf32, #tpu.memory_space<vmem>>, vector<2x512xf32>
    %71 = arith.mulf %60, %69 : vector<2x512xf32>
    %72 = arith.addf %70, %71 : vector<2x512xf32>
    %c0_17 = arith.constant 0 : index
    %c0_18 = arith.constant 0 : index
    %73 = vector.load %arg4[%c0_17, %c0_18] : memref<2x512xf32, #tpu.memory_space<vmem>>, vector<2x512xf32>
    tpu.vector_store %arg4[%c0_17, %c0_18], %72 {strides = array<i32>} : memref<2x512xf32, #tpu.memory_space<vmem>>, vector<2x512xf32>,
    return
  }
  func.func @transform_0(%arg0: i32) -> (i32, i32) {
    %c0_i32 = arith.constant 0 : i32
    %c0_i32_0 = arith.constant 0 : i32
    return %c0_i32, %arg0 : i32, i32
  }
  func.func @transform_1(%arg0: i32) -> i32 {
    %c0_i32 = arith.constant 0 : i32
    %c0_i32_0 = arith.constant 0 : i32
    return %c0_i32 : i32
  }
  func.func @transform_2(%arg0: i32) -> i32 {
    %c0_i32 = arith.constant 0 : i32
    %c0_i32_0 = arith.constant 0 : i32
    return %c0_i32 : i32
  }
  func.func @transform_3(%arg0: i32) -> (i32, i32) {
    %c0_i32 = arith.constant 0 : i32
    %c0_i32_0 = arith.constant 0 : i32
    return %c0_i32, %arg0 : i32, i32
  }
}

</mosaic_0001>

<bundles_post_ra>
// kernel: tpu_custom_call.1
= control target key start
LH: loop header
LB: loop body
LE: loop exit
PB: predicated region body
PF: predicated region fallthrough
CT: control target
= control target key end

     0   :  { %9 = vsyncpa [#allocation4], 0  ;;  %s624_s0 = inlined_call_operand.hbm [shape: f32[2,512], index: 0, kind: input, shape index: {}]   ;;  %s625_s1 = inlined_call_operand.<no memory space> [shape: s32[1], index: 1, kind: input, shape index: {}]   ;;  %s626_s2 = inlined_call_operand.vmem [shape: f32[2], index: 2, kind: input, shape index: {}]   ;;  %s627_s3 = inlined_call_operand.hbm [shape: f32[2,512], index: 3, kind: output, shape index: {}]  }
   0x1   :  { %10 = vsyncpa [#allocation6], 0 }
   0x2   :  { %11 = vsyncpa [#allocation5], 0  ;;  %s30_s14 = sshll.u32 %s626_s2, 4  ;;  %s378_s15 = smov [#allocation3]   ;;  %s31_s14 = int_to_ptr.vmem [resolvable:$true] %s30_s14 }
   0x3   :  { %s18_s16 = sshll.u32 %s378_s15, 4  ;;  %s19_s16 = int_to_ptr.vmem [resolvable:$true] %s18_s16 }
   0x4   :  { %s328_s17 = scalar_lea.vmem %s19_s16, 128  ;;  %p333_p1 = scmp.lt.s32.totalorder %s19_s16, %s19_s16 }
   0x5   :  { %p329_p0 = scmp.ne.s32.totalorder %s19_s16, %s328_s17  ;;  %p334_p2 = scmp.lt.s32.totalorder %s328_s17, %s328_s17 }
   0x7   :  { %p335_p3 = por %p334_p2, %p333_p1 }
   0x9   :  { %p336_p4 = pnand %p335_p3, %p329_p0 }
   0xb   :  { %339 = shalt.err (!%p336_p4)
}
   0xc   :  { %21 = dma.hbm_to_vmem [thread:$0]  %s624_s0, 128, %s19_s16, [#allocation4]  }
   0xd   :  { %s340_s20 = scalar_lea.vmem %s31_s14, 16  ;;  %p345_p6 = scmp.lt.s32.totalorder %s31_s14, %s31_s14 }
   0xe   :  { %p341_p5 = scmp.ne.s32.totalorder %s31_s14, %s340_s20  ;;  %p346_p7 = scmp.lt.s32.totalorder %s340_s20, %s340_s20 }
  0x10   :  { %p347_p8 = por %p346_p7, %p345_p6 }
  0x12   :  { %p348_p9 = pnand %p347_p8, %p341_p5 }
  0x14   :  { %351 = shalt.err (!%p348_p9)
}
  0x15   :  { %s379_s2 = smov [#allocation7]  }
  0x16   :  { %33 = dma.vmem_to_smem %s31_s14, 16, %s379_s2, [#allocation6]  }
  0x17   :  { %372 = dma.done.wait [#allocation4], 128  }
  0x18   :  { %373 = vsyncadd [#allocation4], 4294967168 }
  0x19   :  { %374 = dma.done.wait [#allocation6], 16  }
  0x1a   :  { %375 = vsyncadd [#allocation6], 4294967280 }
  0x1b   :  { %40 = sfence }
  0x1c   :  { %v41_v0 = vlaneseq  ;;  %s60_s23 = smul.u32 1000003, %s625_s1  ;;  %s242_s0 = sld [smem:[#allocation7]] }
  0x1d   :  { %s299_s1 = sld [smem:[#allocation7 + $0x1]]  ;;  %s381_s24 = smov [#allocation8]  }
  0x1e   :  { %v411_v1 = vshrl.u32 %v41_v0, 7  ;;  %v413_v2 = vand.u32 127, %v41_v0  ;;  %v61_v7 = vstv %s60_s23  ;;  %s285_s25 = sshll.u32 %s381_s24, 4  ;;  %s286_s25 = int_to_ptr.vmem [resolvable:$true] %s285_s25 }
  0x1f   :  { %s352_s26 = scalar_lea.vmem %s286_s25, 128  ;;  %p357_p11 = scmp.lt.s32.totalorder %s286_s25, %s286_s25 }
  0x20   :  { %v416_v3 = vadd.s32 128, %v413_v2  ;;  %v419_v4 = vadd.s32 256, %v413_v2  ;;  %v422_v5 = vadd.s32 384, %v413_v2  ;;  %v54_v6 = vmul.u32 512, %v411_v1  ;;  %p353_p10 = scmp.ne.s32.totalorder %s286_s25, %s352_s26  ;;  %p358_p12 = scmp.lt.s32.totalorder %s352_s26, %s352_s26 }
  0x22   :  { %v55_v8 = vadd.s32 %v54_v6, %v413_v2  ;;  %v56_v9 = vadd.s32 %v54_v6, %v416_v3  ;;  %v57_v10 = vadd.s32 %v54_v6, %v419_v4  ;;  %v58_v11 = vadd.s32 %v54_v6, %v422_v5  ;;  %p359_p13 = por %p358_p12, %p357_p11 }
  0x24   :  { %v62_v12 = vadd.s32 %v61_v7, %v55_v8  ;;  %v63_v13 = vadd.s32 %v61_v7, %v56_v9  ;;  %v64_v14 = vadd.s32 %v61_v7, %v57_v10  ;;  %v65_v15 = vadd.s32 %v61_v7, %v58_v11  ;;  %p360_p0 = pnand %p359_p13, %p353_p10 }
  0x26   :  { %v66_v16 = vshra.s32 %v62_v12, 16  ;;  %v67_v17 = vshra.s32 %v63_v13, 16  ;;  %v68_v18 = vshra.s32 %v64_v14, 16  ;;  %v69_v19 = vshra.s32 %v65_v15, 16 }
  0x27   :  { %v98_v20 = vxor.u32 1779033703, %v62_v12  ;;  %v99_v21 = vxor.u32 1779033703, %v63_v13  ;;  %v100_v22 = vxor.u32 1779033703, %v64_v14 }
  0x28   :  { %v70_v23 = vxor.u32 %v66_v16, %v62_v12  ;;  %v71_v24 = vxor.u32 %v67_v17, %v63_v13  ;;  %v72_v25 = vxor.u32 %v68_v18, %v64_v14  ;;  %v73_v26 = vxor.u32 %v69_v19, %v65_v15 }
  0x29   :  { %v101_v27 = vxor.u32 1779033703, %v65_v15  ;;  %v102_v28 = vshra.s32 %v98_v20, 16  ;;  %v103_v29 = vshra.s32 %v99_v21, 16  ;;  %v104_v30 = vshra.s32 %v100_v22, 16 }
  0x2a   :  { %v74_v31 = vmul.u32 73244475, %v70_v23  ;;  %v75_v32 = vmul.u32 73244475, %v71_v24 }
  0x2b   :  { %v76_v33 = vmul.u32 73244475, %v72_v25  ;;  %v77_v34 = vmul.u32 73244475, %v73_v26  ;;  %v105_v35 = vshra.s32 %v101_v27, 16  ;;  %v106_v36 = vxor.u32 %v102_v28, %v98_v20 }
  0x2c   :  { %v78_v37 = vshra.s32 %v74_v31, 16  ;;  %v79_v38 = vshra.s32 %v75_v32, 16  ;;  %v107_v39 = vxor.u32 %v103_v29, %v99_v21  ;;  %v108_v40 = vxor.u32 %v104_v30, %v100_v22 }
  0x2d   :  { %v80_v41 = vshra.s32 %v76_v33, 16  ;;  %v81_v42 = vshra.s32 %v77_v34, 16  ;;  %v109_v43 = vxor.u32 %v105_v35, %v101_v27  ;;  %v110_v44 = vmul.u32 73244475, %v106_v36 }
  0x2e   :  { %v82_v45 = vxor.u32 %v78_v37, %v74_v31  ;;  %v83_v46 = vxor.u32 %v79_v38, %v75_v32  ;;  %v111_v47 = vmul.u32 73244475, %v107_v39  ;;  %v112_v48 = vmul.u32 73244475, %v108_v40 }
  0x2f   :  { %v84_v49 = vxor.u32 %v80_v41, %v76_v33  ;;  %v85_v50 = vxor.u32 %v81_v42, %v77_v34  ;;  %v113_v51 = vmul.u32 73244475, %v109_v43  ;;  %v114_v52 = vshra.s32 %v110_v44, 16 }
  0x30   :  { %v86_v53 = vmul.u32 73244475, %v82_v45  ;;  %v87_v54 = vmul.u32 73244475, %v83_v46  ;;  %v115_v55 = vshra.s32 %v111_v47, 16  ;;  %v116_v56 = vshra.s32 %v112_v48, 16 }
  0x31   :  { %v88_v57 = vmul.u32 73244475, %v84_v49  ;;  %v89_v58 = vmul.u32 73244475, %v85_v50  ;;  %v117_v59 = vshra.s32 %v113_v51, 16  ;;  %v118_v60 = vxor.u32 %v114_v52, %v110_v44 }
  0x32   :  { %v90_v61 = vshra.s32 %v86_v53, 16  ;;  %v91_v62 = vshra.s32 %v87_v54, 16  ;;  %v119_v63 = vxor.u32 %v115_v55, %v111_v47  ;;  %v120_v0 = vxor.u32 %v116_v56, %v112_v48 }
  0x33   :  { %v92_v6 = vshra.s32 %v88_v57, 16  ;;  %v93_v7 = vshra.s32 %v89_v58, 16  ;;  %v121_v8 = vxor.u32 %v117_v59, %v113_v51  ;;  %v122_v9 = vmul.u32 73244475, %v118_v60 }
  0x34   :  { %v429_v10 = vxor.u32 %v90_v61, %v86_v53  ;;  %v431_v11 = vxor.u32 %v91_v62, %v87_v54  ;;  %v123_v12 = vmul.u32 73244475, %v119_v63  ;;  %v124_v13 = vmul.u32 73244475, %v120_v0 }
  0x35   :  { %v433_v14 = vxor.u32 %v92_v6, %v88_v57  ;;  %v435_v15 = vxor.u32 %v93_v7, %v89_v58  ;;  %v125_v16 = vmul.u32 73244475, %v121_v8  ;;  %v126_v17 = vshra.s32 %v122_v9, 16 }
  0x36   :  { %v127_v18 = vshra.s32 %v123_v12, 16  ;;  %v128_v19 = vshra.s32 %v124_v13, 16  ;;  %v134_v20 = vand.u32 16777215, %v429_v10  ;;  %v135_v21 = vand.u32 16777215, %v431_v11 }
  0x37   :  { %v129_v22 = vshra.s32 %v125_v16, 16  ;;  %v130_v23 = vxor.u32 %v126_v17, %v122_v9  ;;  %v136_v24 = vand.u32 16777215, %v433_v14  ;;  %v137_v25 = vand.u32 16777215, %v435_v15 }
  0x38   :  { %v131_v26 = vxor.u32 %v127_v18, %v123_v12  ;;  %v132_v27 = vxor.u32 %v128_v19, %v124_v13  ;;  %v138_v28 = vcvt.s32.f32 %v134_v20  ;;  %v139_v29 = vcvt.s32.f32 %v135_v21  ;;  %v250_v18 = vld [vmem:[#allocation3] sm:$0xff] }
  0x39   :  { %v133_v30 = vxor.u32 %v129_v22, %v125_v16  ;;  %v140_v31 = vcvt.s32.f32 %v136_v24  ;;  %v141_v32 = vcvt.s32.f32 %v137_v25  ;;  %v178_v33 = vand.u32 16777215, %v130_v23 }
  0x3a   :  { %v441_v34 = vmul.f32 5.9604645e-08, %v138_v28  ;;  %v443_v35 = vmul.f32 5.9604645e-08, %v139_v29  ;;  %v179_v38 = vand.u32 16777215, %v131_v26  ;;  %v180_v39 = vand.u32 16777215, %v132_v27 }
  0x3b   :  { %v445_v36 = vmul.f32 5.9604645e-08, %v140_v31  ;;  %v447_v37 = vmul.f32 5.9604645e-08, %v141_v32  ;;  %v181_v40 = vand.u32 16777215, %v133_v30  ;;  %v182_v41 = vcvt.s32.f32 %v178_v33 }
  0x3c   :  { %304 = vrsqrt.f32 %v441_v34  ;;  %v234_v42 = vand.u32 1, %v413_v2  ;;  %v235_v43 = vand.u32 1, %v416_v3  ;;  %v183_v44 = vcvt.s32.f32 %v179_v38 }
  0x3d   :  { %306 = vrsqrt.f32 %v443_v35  ;;  %v184_v45 = vcvt.s32.f32 %v180_v39  ;;  %v185_v46 = vcvt.s32.f32 %v181_v40  ;;  %v455_v47 = vmul.f32 5.9604645e-08, %v182_v41 }
  0x3e   :  { %308 = vrsqrt.f32 %v445_v36  ;;  %v380_v48 = vmov 1983009808   ;;  %v459_v50 = vmul.f32 5.9604645e-08, %v183_v44  ;;  %vm466_vm0 = vcmp.eq.s32.totalorder %v234_v42, 0 }
  0x3f   :  { %310 = vrsqrt.f32 %v447_v37  ;;  %v457_v49 = vunpack.c.l.s4 %v380_v48  ;;  %v461_v51 = vmul.f32 5.9604645e-08, %v184_v45  ;;  %v463_v52 = vmul.f32 5.9604645e-08, %v185_v46 }
  0x40   :  { %312 = vrsqrt.f32 %v455_v47  ;;  %vm471_vm1 = vcmp.eq.s32.totalorder %v235_v43, 0  ;;  %v475_v53 = vstv %s242_s0  ;;  %v477_v54 = vstv %s299_s1 }
  0x41   :  { %314 = vrsqrt.f32 %v459_v50  ;;  %v236_v55 = vand.u32 1, %v419_v4  ;;  %v237_v56 = vand.u32 1, %v422_v5  ;;  %v263_v57 = vunpack.c.0.s8 %v457_v49 }
  0x42   :  { %316 = vrsqrt.f32 %v461_v51  ;;  %vm148_vm2 = vcmp.eq.f32.partialorder %v441_v34, inf  ;;  %vm150_vm3 = vcmp.eq.f32.partialorder %v441_v34, 0.0  ;;  %v246_v58 = vsel %vm466_vm0, %v475_v53, %v477_v54 }
  0x43   :  { %318 = vrsqrt.f32 %v463_v52  ;;  %v247_v59 = vsel %vm471_vm1, %v475_v53, %v477_v54  ;;  %v151_v4 = vand.u32 2147483648, %v441_v34  ;;  %vm155_vm4 = vcmp.eq.f32.partialorder %v443_v35, inf }
  0x44   :  { %vm157_vm5 = vcmp.eq.f32.partialorder %v443_v35, 0.0  ;;  %v158_v5 = vand.u32 2147483648, %v443_v35  ;;  %vm162_vm6 = vcmp.eq.f32.partialorder %v445_v36, inf  ;;  %vm164_vm7 = vcmp.eq.f32.partialorder %v445_v36, 0.0 }
  0x45   :  { %v165_v61 = vand.u32 2147483648, %v445_v36  ;;  %v222_v62 = vand.u32 16777216, %v429_v10  ;;  %vm169_vm8 = vcmp.eq.f32.partialorder %v447_v37, inf  ;;  %vm171_vm9 = vcmp.eq.f32.partialorder %v447_v37, 0.0 }
  0x46   :  { %v172_v6 = vand.u32 2147483648, %v447_v37  ;;  %v223_v9 = vand.u32 16777216, %v431_v11  ;;  %v224_v12 = vand.u32 16777216, %v433_v14  ;;  %v225_v13 = vand.u32 16777216, %v435_v15 }
  0x47   :  { %vm192_vm10 = vcmp.eq.f32.partialorder %v455_v47, inf  ;;  %vm194_vm11 = vcmp.eq.f32.partialorder %v455_v47, 0.0  ;;  %vm516_vm12 = vcmp.eq.s32.totalorder %v236_v55, 0  ;;  %v195_v14 = vand.u32 2147483648, %v455_v47 }
  0x48   :  { %vm523_vm14 = vcmp.eq.s32.totalorder %v222_v62, 0  ;;  %vm527_vm15 = vcmp.eq.s32.totalorder %v237_v56, 0  ;;  %v202_v22 = vand.u32 2147483648, %v459_v50  ;;  %vm206_vm13 = vcmp.eq.f32.partialorder %v461_v51, inf }
  0x49   :  { %v305_v60 = vpop.eup %304  ;;  %v209_v27 = vand.u32 2147483648, %v461_v51  ;;  %v216_v31 = vand.u32 2147483648, %v463_v52 }
  0x4a   :  { %v307_v63 = vpop.eup %306  ;;  %v147_v0 = vmul.f32 %v305_v60, %v441_v34 }
  0x4b   :  { %v309_v7 = vpop.eup %308  ;;  %v154_v8 = vmul.f32 %v307_v63, %v443_v35  ;;  %v248_v63 = vsel %vm516_vm12, %v475_v53, %v477_v54 }
  0x4c   :  { %v311_v16 = vpop.eup %310  ;;  %v149_v10 = vsel %vm148_vm2, %v441_v34, %v147_v0  ;;  %v161_v17 = vmul.f32 %v309_v7, %v445_v36  ;;  %vm215_vm2 = vcmp.eq.f32.partialorder %v463_v52, 0.0 }
  0x4d   :  { %v168_v11 = vmul.f32 %v311_v16, %v447_v37  ;;  %v152_v20 = vsel %vm150_vm3, %v151_v4, %v149_v10  ;;  %v156_v21 = vsel %vm155_vm4, %v443_v35, %v154_v8  ;;  %v313_v23 = vpop.eup %312  ;;  %vm208_vm3 = vcmp.eq.f32.partialorder %v461_v51, 0.0 }
  0x4e   :  { %v163_v24 = vsel %vm162_vm6, %v445_v36, %v161_v17  ;;  %v191_v26 = vmul.f32 %v313_v23, %v455_v47  ;;  %vm213_vm4 = vcmp.eq.f32.partialorder %v463_v52, inf  ;;  %v315_v28 = vpop.eup %314  ;;  %v159_v29 = vsel %vm157_vm5, %v158_v5, %v156_v21 }
  0x4f   :  { %v170_v25 = vsel %vm169_vm8, %v447_v37, %v168_v11  ;;  %v295_v30 = vadd.f32 -1.0, %v152_v20  ;;  %vm553_vm6 = vcmp.eq.s32.totalorder %v223_v9, 0  ;;  %v317_v33 = vpop.eup %316  ;;  %v166_v34 = vsel %vm164_vm7, %v165_v61, %v163_v24 }
  0x50   :  { %v173_v38 = vsel %vm171_vm9, %v172_v6, %v170_v25  ;;  %v193_v39 = vsel %vm192_vm10, %v455_v47, %v191_v26  ;;  %v198_v35 = vmul.f32 %v315_v28, %v459_v50  ;;  %v319_v40 = vpop.eup %318  ;;  %v205_v42 = vmul.f32 %v317_v33, %v461_v51 }
  0x51   :  { %v196_v41 = vsel %vm194_vm11, %v195_v14, %v193_v39  ;;  %vm568_vm5 = vcmp.eq.s32.totalorder %v224_v12, 0  ;;  %vm572_vm7 = vcmp.eq.s32.totalorder %v225_v13, 0  ;;  %v296_v37 = vadd.f32 -1.0, %v159_v29 }
  0x52   :  { %vm644_vm8 = vcmp.eq.f32.partialorder %v459_v50, inf  ;;  %v212_v45 = vmul.f32 %v319_v40, %v463_v52  ;;  %v218_v46 = vsub.f32 1.0, %v196_v41  ;;  %v297_v47 = vadd.f32 -1.0, %v166_v34 }
  0x53   :  { %v200_v44 = vsel %vm644_vm8, %v459_v50, %v198_v35  ;;  %v298_v48 = vadd.f32 -1.0, %v173_v38  ;;  %vm645_vm9 = vcmp.eq.f32.partialorder %v459_v50, 0.0  ;;  %v207_v56 = vsel %vm206_vm13, %v461_v51, %v205_v42 }
  0x54   :  { %v203_v55 = vsel %vm645_vm9, %v202_v22, %v200_v44  ;;  %v210_v4 = vsel %vm208_vm3, %v209_v27, %v207_v56  ;;  %v214_v5 = vsel %vm213_vm4, %v463_v52, %v212_v45  ;;  %v230_v61 = vsel %vm523_vm14, %v295_v30, %v218_v46 }
  0x55   :  { %v219_v60 = vsub.f32 1.0, %v203_v55  ;;  %v217_v62 = vsel %vm215_vm2, %v216_v31, %v214_v5  ;;  %v220_v50 = vsub.f32 1.0, %v210_v4  ;;  %v251_v51 = vmul.f32 %v246_v58, %v230_v61 }
  0x56   :  { %v221_v0 = vsub.f32 1.0, %v217_v62  ;;  %v249_v52 = vsel %vm527_vm15, %v475_v53, %v477_v54  ;;  %v266_v58 = vsub.s32 %v263_v57, %v411_v1 }
  0x57   :  { %v231_v6 = vsel %vm553_vm6, %v296_v37, %v219_v60  ;;  %v232_v7 = vsel %vm568_vm5, %v297_v47, %v220_v50 }
  0x58   :  { %v252_v2 = vmul.f32 %v247_v59, %v231_v6  ;;  %v233_v8 = vsel %vm572_vm7, %v298_v48, %v221_v0  ;;  %v253_v9 = vmul.f32 %v248_v63, %v232_v7 }
  0x59   :  { %v254_v12 = vmul.f32 %v249_v52, %v233_v8 }
  0x5a   :  { %v259_v13 = vcombine.low %v251_v51, %v252_v2 }
  0x5b   :  { %v260_v16 = vcombine.low %v253_v9, %v254_v12 }
  0x5c   :  { %v267_v10 = vrot.slane %v259_v13, %v266_v58 }
  0x5d   :  { %v274_v17 = vrot.slane %v260_v16, %v266_v58 }
  0x5f   :  { %v275_v3 = vcombine.low %v267_v10, %v274_v17 }
  0x61   :  { %v277_v11 = vadd.f32 %v275_v3, %v250_v18 }
  0x63   :  { %278 = vst [vmem:[#allocation8] sm:$0xff] %v277_v11 }
  0x64   :  { %363 = shalt.err (!%p360_p0)
}
  0x65   :  { %288 = dma.vmem_to_hbm [thread:$0]  %s286_s25, 128, %s627_s3, [#allocation5]  }
  0x66   :  { %376 = dma.done.wait [#allocation5], 128  }
  0x67   :  { %377 = vsyncadd [#allocation5], 4294967168 }
  0x68   :  { %292 = vsyncpa [#allocation4], 1 }
  0x69   :  { %293 = vsyncpa [#allocation5], 1 }
  0x6a   :  { %294 = vsyncpa [#allocation6], 1 }

</bundles_post_ra>
